<compile_context>
chip_gen: v6e
topology: v6e:2x2x1
jax: 0.10.0
libtpu: 0.0.40
codegen_flags: <defaults>
</compile_context>

<pallas_src>
import jax
import jax.numpy as jnp
from jax.experimental import pallas as pl
from jax.experimental.pallas import tpu as pltpu


def _make_mfb_kernel(num_location):
    """Kernel factory; `num_location` (L) is a static closure value."""

    def kernel(img_ref, ques_ref, w_ref, b_ref, out_ref):
        # img_ref : (TM, D_img)   TM = TB * L rows of the flattened (B*L) axis
        # ques_ref: (TB, TN)      precomputed question projection for the TB batches of this tile
        # w_ref   : (D_img, TN)   image-linear weight, N-tiled
        # b_ref   : (1, TN)       image-linear bias, N-tiled
        # out_ref : (TM, TN)
        acc = jnp.dot(img_ref[...], w_ref[...], preferred_element_type=jnp.float32)
        acc = acc + b_ref[...].astype(jnp.float32)
        q = ques_ref[...].astype(jnp.float32)
        if num_location == 1:
            joint = acc * q
        else:
            tm, tn = acc.shape
            tb = tm // num_location
            # Broadcast ques1 over the L (location) axis on the VPU; the logical row split keeps
            # the lane axis intact, so no HBM materialisation of the expanded tensor is needed.
            joint = (acc.reshape(tb, num_location, tn) * q[:, None, :]).reshape(tm, tn)
        out_ref[...] = joint.astype(out_ref.dtype)

    return kernel


_VMEM_BUDGET = 48 << 20  # leave headroom under the 64 MiB limit we request


def _pick_tb(b, l, d_img):
    """TB batches per tile: target ~512 matmul rows, TB multiple of 8 or == B, image block small."""
    # Keep the double-buffered f32 image block under ~16 MiB even for very wide D_img.
    max_rows = max(8, (16 << 20) // (2 * 4 * max(d_img, 1)))
    target_rows = min(512, max_rows)
    tb = max(1, target_rows // max(l, 1))
    if tb >= b:
        return b
    tb = (tb // 8) * 8
    if tb < 8:
        return b
    return tb


def _pick_tn(h, d_img, tm, tb):
    """Lane-dense TN (multiple of 128) chosen against a double-buffered VMEM estimate."""
    if h < 128:
        return h
    max_tn = (h // 128) * 128
    for tn in (1024, 768, 512, 384, 256, 128):
        if tn > max_tn:
            continue
        est = 2 * 4 * (tm * d_img + d_img * tn + tb * tn + tn + tm * tn)  # f32 worst case
        if est <= _VMEM_BUDGET:
            return tn
    return 128


def mfb_expand(image_feat, question_embed, w_img, b_img, w_q, b_q):
    """Pallas implementation of MfbExpand.forward (dropout = identity / eval mode).

    Linear weights are stored as (in_features, out_features), i.e. transposed vs PyTorch.
    """
    if image_feat.ndim == 2:
        B, D_img = image_feat.shape
        L = 1
        img_flat = image_feat
    else:
        B, L, D_img = image_feat.shape
        img_flat = image_feat.reshape(B * L, D_img)

    H = w_img.shape[-1]
    M = B * L

    # Question projection: tiny (B, D_txt) @ (D_txt, H); done once in plain XLA so the kernel
    # never pads a handful of rows to a full MXU tile per grid step.
    ques1 = jnp.dot(question_embed, w_q, preferred_element_type=jnp.float32) + b_q
    ques1 = ques1.astype(jnp.float32)

    b_img2 = b_img.reshape(1, H)

    TB = _pick_tb(B, L, D_img)
    TM = TB * L
    TN = _pick_tn(H, D_img, TM, TB)
    grid = (pl.cdiv(B, TB), pl.cdiv(H, TN))

    itemsize = jnp.dtype(image_feat.dtype).itemsize
    cost = pl.CostEstimate(
        flops=2 * M * D_img * H,
        transcendentals=0,
        bytes_accessed=(
            M * D_img * itemsize            # image activations (read once, resident over H axis)
            + D_img * H * 4 * grid[0]       # weights re-streamed per row block
            + B * H * 4                     # ques1
            + M * H * itemsize              # output
        ),
    )

    out_flat = pl.pallas_call(
        _make_mfb_kernel(L),
        out_shape=jax.ShapeDtypeStruct((M, H), image_feat.dtype),
        grid_spec=pltpu.PrefetchScalarGridSpec(
            num_scalar_prefetch=0,
            grid=grid,
            in_specs=[
                pl.BlockSpec((TM, D_img), lambda i, j: (i, 0)),  # flattened image rows (resident over j)
                pl.BlockSpec((TB, TN), lambda i, j: (i, j)),     # precomputed ques1 tile
                pl.BlockSpec((D_img, TN), lambda i, j: (0, j)),  # image weight, N-tiled
                pl.BlockSpec((1, TN), lambda i, j: (0, j)),      # image bias, N-tiled
            ],
            out_specs=pl.BlockSpec((TM, TN), lambda i, j: (i, j)),
        ),
        compiler_params=pltpu.CompilerParams(
            dimension_semantics=("parallel", "parallel"),
            vmem_limit_bytes=64 << 20,
        ),
        cost_estimate=cost,
    )(img_flat, ques1, w_img, b_img2)

    if image_feat.ndim == 2:
        return out_flat
    return out_flat.reshape(B, L, H)


def _reference(image_feat, question_embed, w_img, b_img, w_q, b_q):
    image1 = image_feat @ w_img + b_img
    ques1 = question_embed @ w_q + b_q
    if image_feat.ndim == 3:
        ques1 = ques1[:, None, :]
    return image1 * ques1


if __name__ == "__main__":
    # Small shapes consistent with the module: batch=2, num_location=8,
    # img_feat_dim=32, txt_emb_dim=16, hidden=32.
    B, L, D_IMG, D_TXT, H = 2, 8, 32, 16, 32

    key = jax.random.PRNGKey(0)
    k_img, k_q, k_wimg, k_bimg, k_wq, k_bq = jax.random.split(key, 6)

    image_feat = jax.random.normal(k_img, (B, L, D_IMG), dtype=jnp.float32)
    question_embed = jax.random.normal(k_q, (B, D_TXT), dtype=jnp.float32)

    # Deterministic parameter init (weights stored as (in, out)).
    w_img = jax.random.normal(k_wimg, (D_IMG, H), dtype=jnp.float32) * 0.05
    b_img = jax.random.normal(k_bimg, (H,), dtype=jnp.float32) * 0.05
    w_q = jax.random.normal(k_wq, (D_TXT, H), dtype=jnp.float32) * 0.05
    b_q = jax.random.normal(k_bq, (H,), dtype=jnp.float32) * 0.05

    out = mfb_expand(image_feat, question_embed, w_img, b_img, w_q, b_q)
    out = jax.block_until_ready(out)

    ref = _reference(image_feat, question_embed, w_img, b_img, w_q, b_q)
    assert out.shape == (B, L, H), out.shape
    assert jnp.allclose(out, ref, atol=1e-5, rtol=1e-5), "mismatch vs reference"

    # Also exercise the 2-D image-feature path (len(shape)==2 branch, no location broadcast).
    out2 = mfb_expand(image_feat[:, 0, :], question_embed, w_img, b_img, w_q, b_q)
    out2 = jax.block_until_ready(out2)
    ref2 = _reference(image_feat[:, 0, :], question_embed, w_img, b_img, w_q, b_q)
    assert out2.shape == (B, H), out2.shape
    assert jnp.allclose(out2, ref2, atol=1e-5, rtol=1e-5), "mismatch vs reference (2-D)"

    print("KERNEL_OK")
</pallas_src>

<mosaic_0001>
module attributes {stable_mosaic.version = 11 : i64} {
  func.func @kernel(%arg0: i32, %arg1: i32, %arg2: memref<16x32xf32, #tpu.memory_space<vmem>>, %arg3: memref<2x32xf32, #tpu.memory_space<vmem>>, %arg4: memref<32x32xf32, #tpu.memory_space<vmem>>, %arg5: memref<1x32xf32, #tpu.memory_space<vmem>>, %arg6: memref<16x32xf32, #tpu.memory_space<vmem>>) attributes {dimension_semantics = [#tpu.dimension_semantics<parallel>, #tpu.dimension_semantics<parallel>], iteration_bounds = array<i64: 1, 1>, scalar_prefetch = 0 : i64, scratch_operands = 0 : i64, tpu.core_type = #tpu.core_type<tc>, window_params = [{transform_indices = @transform_0, window_bounds = array<i64: 16, 32>}, {transform_indices = @transform_1, window_bounds = array<i64: 2, 32>}, {transform_indices = @transform_2, window_bounds = array<i64: 32, 32>}, {transform_indices = @transform_3, window_bounds = array<i64: 1, 32>}, {transform_indices = @transform_4, window_bounds = array<i64: 16, 32>}]} {
    %c0 = arith.constant 0 : index
    %c0_0 = arith.constant 0 : index
    %0 = vector.load %arg2[%c0, %c0_0] : memref<16x32xf32, #tpu.memory_space<vmem>>, vector<16x32xf32>
    %c0_1 = arith.constant 0 : index
    %c0_2 = arith.constant 0 : index
    %1 = vector.load %arg4[%c0_1, %c0_2] : memref<32x32xf32, #tpu.memory_space<vmem>>, vector<32x32xf32>
    %cst = arith.constant dense<0.000000e+00> : vector<16x32xf32>
    %2 = tpu.matmul %0, %1, %cst {dimension_numbers = #tpu.dot_dimension_numbers<[1], [0], [0], [1], [0, 0, 1, 1], [], []>} : vector<16x32xf32>, vector<32x32xf32>, vector<16x32xf32> -> vector<16x32xf32>
    %c0_3 = arith.constant 0 : index
    %c0_4 = arith.constant 0 : index
    %3 = vector.load %arg5[%c0_3, %c0_4] : memref<1x32xf32, #tpu.memory_space<vmem>>, vector<1x32xf32>
    %4 = vector.broadcast %3 : vector<1x32xf32> to vector<16x32xf32>
    %5 = arith.addf %2, %4 : vector<16x32xf32>
    %c0_5 = arith.constant 0 : index
    %c0_6 = arith.constant 0 : index
    %6 = vector.load %arg3[%c0_5, %c0_6] : memref<2x32xf32, #tpu.memory_space<vmem>>, vector<2x32xf32>
    %7 = vector.shape_cast %5 : vector<16x32xf32> to vector<2x8x32xf32>
    %8 = vector.shape_cast %6 : vector<2x32xf32> to vector<2x1x32xf32>
    %9 = vector.broadcast %8 : vector<2x1x32xf32> to vector<2x8x32xf32>
    %10 = arith.mulf %7, %9 : vector<2x8x32xf32>
    %11 = vector.shape_cast %10 : vector<2x8x32xf32> to vector<16x32xf32>
    %c0_7 = arith.constant 0 : index
    %c0_8 = arith.constant 0 : index
    %12 = vector.load %arg6[%c0_7, %c0_8] : memref<16x32xf32, #tpu.memory_space<vmem>>, vector<16x32xf32>
    tpu.vector_store %arg6[%c0_7, %c0_8], %11 {strides = array<i32>} : memref<16x32xf32, #tpu.memory_space<vmem>>, vector<16x32xf32>,
    return
  }
  func.func @transform_0(%arg0: i32, %arg1: i32) -> (i32, i32) {
    %c0_i32 = arith.constant 0 : i32
    %c0_i32_0 = arith.constant 0 : i32
    return %arg0, %c0_i32 : i32, i32
  }
  func.func @transform_1(%arg0: i32, %arg1: i32) -> (i32, i32) {
    %c0_i32 = arith.constant 0 : i32
    return %arg0, %arg1 : i32, i32
  }
  func.func @transform_2(%arg0: i32, %arg1: i32) -> (i32, i32) {
    %c0_i32 = arith.constant 0 : i32
    %c0_i32_0 = arith.constant 0 : i32
    return %c0_i32, %arg1 : i32, i32
  }
  func.func @transform_3(%arg0: i32, %arg1: i32) -> (i32, i32) {
    %c0_i32 = arith.constant 0 : i32
    %c0_i32_0 = arith.constant 0 : i32
    return %c0_i32, %arg1 : i32, i32
  }
  func.func @transform_4(%arg0: i32, %arg1: i32) -> (i32, i32) {
    %c0_i32 = arith.constant 0 : i32
    return %arg0, %arg1 : i32, i32
  }
}

</mosaic_0001>

<bundles_post_ra>
// kernel: tpu_custom_call.1
= control target key start
LH: loop header
LB: loop body
LE: loop exit
PB: predicated region body
PF: predicated region fallthrough
CT: control target
= control target key end

     0   :  { %9 = vsyncpa [#allocation3], 0  ;;  %s382_s0 = inlined_call_operand.hbm [shape: f32[16,32], index: 0, kind: input, shape index: {}]   ;;  %s383_s1 = inlined_call_operand.hbm [shape: f32[2,32], index: 1, kind: input, shape index: {}]   ;;  %s384_s2 = inlined_call_operand.hbm [shape: f32[32,32], index: 2, kind: input, shape index: {}]   ;;  %s385_s3 = inlined_call_operand.vmem [shape: f32[1,32], index: 3, kind: input, shape index: {}]   ;;  %s386_s4 = inlined_call_operand.hbm [shape: f32[16,32], index: 4, kind: output, shape index: {}]  }
   0x1   :  { %10 = vsyncpa [#allocation6], 0 }
   0x2   :  { %11 = vsyncpa [#allocation4], 0  ;;  %s322_s15 = smov [#allocation5]   ;;  %s323_s17 = smov [#allocation2]  }
   0x3   :  { %s30_s16 = sshll.u32 %s322_s15, 4  ;;  %s17_s18 = sshll.u32 %s323_s17, 4  ;;  %s31_s16 = int_to_ptr.vmem [resolvable:$true] %s30_s16  ;;  %s18_s18 = int_to_ptr.vmem [resolvable:$true] %s17_s18 }
   0x4   :  { %s244_s19 = scalar_lea.vmem %s31_s16, 32  ;;  %p249_p1 = scmp.lt.s32.totalorder %s31_s16, %s31_s16 }
   0x5   :  { %p245_p0 = scmp.ne.s32.totalorder %s31_s16, %s244_s19  ;;  %p250_p2 = scmp.lt.s32.totalorder %s244_s19, %s244_s19 }
   0x7   :  { %p251_p3 = por %p250_p2, %p249_p1 }
   0x9   :  { %p252_p4 = pnand %p251_p3, %p245_p0 }
   0xb   :  { %255 = shalt.err (!%p252_p4)
}
   0xc   :  { %33 = dma.hbm_to_vmem [thread:$0]  %s383_s1, 32, %s31_s16, [#allocation6]  }
   0xd   :  { %s264_s22 = scalar_lea.vmem %s18_s18, 256  ;;  %p269_p6 = scmp.lt.s32.totalorder %s18_s18, %s18_s18 }
   0xe   :  { %p265_p5 = scmp.ne.s32.totalorder %s18_s18, %s264_s22  ;;  %p270_p7 = scmp.lt.s32.totalorder %s264_s22, %s264_s22 }
  0x10   :  { %p271_p8 = por %p270_p7, %p269_p6 }
  0x12   :  { %p272_p9 = pnand %p271_p8, %p265_p5 }
  0x14   :  { %275 = shalt.err (!%p272_p9)
}
  0x15   :  { %s324_s23 = smov 128   ;;  %s325_s24 = smov 8  }
  0x16   :  { %23 = dma.hbm_to_vmem [thread:$0]  %s382_s0, 256, %s18_s18, [#allocation3], %s324_s23, %s324_s23, %s325_s24  }
  0x17   :  { %s326_s27 = smov [#allocation7]  }
  0x18   :  { %s39_s28 = sshll.u32 %s326_s27, 4  ;;  %s40_s28 = int_to_ptr.vmem [resolvable:$true] %s39_s28 }
  0x19   :  { %s284_s1 = scalar_lea.vmem %s40_s28, 512  ;;  %p289_p11 = scmp.lt.s32.totalorder %s40_s28, %s40_s28 }
  0x1a   :  { %p285_p10 = scmp.ne.s32.totalorder %s40_s28, %s284_s1  ;;  %p290_p12 = scmp.lt.s32.totalorder %s284_s1, %s284_s1 }
  0x1c   :  { %p291_p13 = por %p290_p12, %p289_p11 }
  0x1e   :  { %p292_p0 = pnand %p291_p13, %p285_p10 }
  0x20   :  { %295 = shalt.err (!%p292_p0)
}
  0x21   :  { %45 = dma.hbm_to_vmem [thread:$0]  %s384_s2, 512, %s40_s28, [#allocation6], %s324_s23, %s324_s23, %s325_s24  }
  0x22   :  { %316 = dma.done.wait [#allocation3], 256  }
  0x23   :  { %317 = vsyncadd [#allocation3], 4294967040 }
  0x24   :  { %318 = dma.done.wait [#allocation6], 544  }
  0x25   :  { %319 = vsyncadd [#allocation6], 4294966752  ;;  %vm70_vm0 = vcmask 261120   ;;  %v62_v0 = vld [vmem:[#allocation7 + $0x18] sm:$0xff]  ;;  %v61_v1 = vld [vmem:[#allocation7 + $0x10] sm:$0xff]  ;;  %v165_v8 = vlaneseq  ;;  %s328_s5 = smov [#allocation8]  }
  0x26   :  { %218 = vmatprep.subr.mxu0 %v62_v0  ;;  %v57_v2 = vld [vmem:[#allocation2] sm:$0xff]  ;;  %v59_v4 = vld [vmem:[#allocation7] sm:$0xff]  ;;  %v58_v5 = vld [vmem:[#allocation2 + $0x8] sm:$0xff]  ;;  %v327_v6 = vmov 1966171168   ;;  %s195_s6 = sshll.u32 %s328_s5, 4  ;;  %s196_s6 = int_to_ptr.vmem [resolvable:$true] %s195_s6 }
  0x27   :  { %219 = vmatpush3.msra.mxu0 %v62_v0  ;;  %v60_v3 = vld [vmem:[#allocation7 + $0x8] sm:$0xff]  ;;  %226 = vmatprep.mubr.msk.f32.mxu0 %vm70_vm0, %v57_v2  ;;  %v163_v7 = vunpack.c.l.s4 %v327_v6  ;;  %v166_v10 = vshrl.u32 %v165_v8, 7  ;;  %v211_v11 = vld.sshfl [vmem:[#allocation5] sm:$0x11 pattern:$0x75316420]  ;;  %p301_p2 = scmp.lt.s32.totalorder %s196_s6, %s196_s6 }
  0x28   :  { %220 = vmatprep.subr.mxu0 %v61_v1  ;;  %v161_v12 = vcombine.high %v211_v11, %v211_v11  ;;  %v208_v17 = vld [vmem:[%s385_s3] ss:$0 sm:$0xff]  ;;  %s296_s7 = scalar_lea.vmem %s196_s6, 256 }
  0x29   :  { %221 = vmatpush3.msra.mxu0 %v61_v1  ;;  %v164_v9 = vunpack.c.0.s8 %v163_v7  ;;  %v178_v15 = vsub.s32 0, %v166_v10  ;;  %p297_p1 = scmp.ne.s32.totalorder %s196_s6, %s296_s7  ;;  %p302_p3 = scmp.lt.s32.totalorder %s296_s7, %s296_s7 }
  0x2a   :  { %222 = vmatprep.subr.mxu0 %v60_v3 }
  0x2b   :  { %223 = vmatpush3.msra.mxu0 %v60_v3  ;;  %v167_v13 = vsub.s32 %v164_v9, %v166_v10  ;;  %p303_p4 = por %p302_p3, %p301_p2 }
  0x2c   :  { %224 = vmatprep.subr.mxu0 %v59_v4 }
  0x2d   :  { %225 = vmatpush3.msra.mxu0 %v59_v4  ;;  %v175_v14 = vrot.slane %v161_v12, %v167_v13  ;;  %v168_v16 = vrot.slane %v211_v11, %v167_v13  ;;  %p304_p5 = pnand %p303_p4, %p297_p1 }
  0x2e   :  { %227 = vmatmul.mubr.msk.f32.vlgmr.msra.gmra.mxu0 %vm70_vm0, %v58_v5 }
  0x2f   :  { %v183_v18 = vrot.slane %v175_v14, %v178_v15  ;;  %v179_v21 = vrot.slane %v168_v16, %v178_v15 }
  0xee   :  { %v228_v19 = vpop.f32.mrf.mxu0 }
  0xef   :  { %v149_v20 = vadd.f32 %v228_v19, %v208_v17 }
  0xf0   :  { %v143_v22 = vpop.f32.mrf.mxu0 }
  0xf1   :  { %v187_v23 = vmul.f32 %v183_v18, %v149_v20  ;;  %v144_v24 = vadd.f32 %v208_v17, %v143_v22 }
  0xf3   :  { %189 = vst.msk [vmem:[#allocation8 + $0x8] sm:$0xff] %vm70_vm0, %v187_v23  ;;  %v186_v25 = vmul.f32 %v179_v21, %v144_v24 }
  0xf5   :  { %188 = vst.msk [vmem:[#allocation8] sm:$0xff] %vm70_vm0, %v186_v25 }
  0xf6   :  { %307 = shalt.err (!%p304_p5)
}
  0xf7   :  { %201 = dma.vmem_to_hbm [thread:$0]  %s196_s6, 256, %s386_s4, [#allocation4], %s324_s23, %s324_s23, %s325_s24  }
  0xf8   :  { %320 = dma.done.wait [#allocation4], 256  }
  0xf9   :  { %321 = vsyncadd [#allocation4], 4294967040 }
  0xfa   :  { %205 = vsyncpa [#allocation3], 1 }
  0xfb   :  { %206 = vsyncpa [#allocation6], 1 }
  0xfc   :  { %207 = vsyncpa [#allocation4], 1 }

</bundles_post_ra>
